<compile_context>
chip_gen: v7x
topology: tpu7x:2x2x1
jax: 0.10.0
libtpu: 0.0.40
codegen_flags: <defaults>
</compile_context>

<pallas_src>
import jax
import jax.numpy as jnp
from jax.experimental import pallas as pl
from jax.experimental.pallas import tpu as pltpu


TB_MAX = 4096  # max batch rows per grid step (fits v5e/v6e/v7x VMEM budgets)


def linear_relu_kernel(x_ref, w_ref, b_ref, o_ref):
    # x_ref: (tb, 784), w_ref: (784, 10), b_ref: (1, 10), o_ref: (tb, 10)
    y = jnp.dot(x_ref[...], w_ref[...], preferred_element_type=jnp.float32)
    y = y + b_ref[...]            # (1, 10) broadcasts over rows
    o_ref[...] = jnp.maximum(y, 0.0).astype(o_ref.dtype)


def _round_up(v, m):
    return ((v + m - 1) // m) * m


def _choose_tb(B):
    """Batch tile: block dim must be a multiple of 8 or equal the full dim.

    For B <= 8 use the full dim (always legal). Otherwise target >= 2 grid
    steps (so v7x's two TensorCores both get work) and cap at TB_MAX.
    """
    if B <= 8:
        return B
    half = _round_up(pl.cdiv(B, 2), 8)
    return min(TB_MAX, half)


def one_layer_network(x_nchw, w, b):
    """Forward pass of OneLayerNetwork.

    x_nchw: (B, C, H, W) float32  (C*H*W must equal 784)
    w:      (784, 10)    float32  (transposed PyTorch weight: (in, out))
    b:      (10,)        float32
    returns (B, 10) float32
    """
    B = x_nchw.shape[0]
    K, N = w.shape  # 784, 10

    # x.view(B, -1): contiguous reshape, free in XLA. No padding of any kind.
    x_flat = x_nchw.reshape(B, -1).astype(jnp.float32)
    w32 = w.astype(jnp.float32)
    b2 = b.astype(jnp.float32).reshape(1, N)

    tb = _choose_tb(B)
    grid = (pl.cdiv(B, tb),)

    cost = pl.CostEstimate(
        flops=2 * B * K * N,
        bytes_accessed=B * K * 4 + B * N * 4 + K * N * 4 + N * 4,
        transcendentals=0,
    )

    out = pl.pallas_call(
        linear_relu_kernel,
        out_shape=jax.ShapeDtypeStruct((B, N), jnp.float32),
        grid_spec=pl.GridSpec(
            grid=grid,
            in_specs=[
                # x streams through VMEM in (tb, 784) blocks (K == full dim).
                pl.BlockSpec((tb, K), lambda i: (i, 0)),
                # W and bias are resident: index_map is grid-invariant.
                pl.BlockSpec((K, N), lambda i: (0, 0)),
                pl.BlockSpec((1, N), lambda i: (0, 0)),
            ],
            # N == full dim (10): masked stores, but output is ~1% of traffic.
            out_specs=pl.BlockSpec((tb, N), lambda i: (i, 0)),
        ),
        compiler_params=pltpu.CompilerParams(
            dimension_semantics=("parallel",),
            vmem_limit_bytes=48 * 1024 * 1024,
        ),
        cost_estimate=cost,
    )(x_flat, w32, b2)

    return out


if __name__ == "__main__":
    key = jax.random.PRNGKey(0)
    k_x, k_w, k_b = jax.random.split(key, 3)

    # Small batch, MNIST-like input shape implied by the module: (B, 1, 28, 28)
    B = 2
    x = jax.random.normal(k_x, (B, 1, 28, 28), dtype=jnp.float32)

    # Deterministic PyTorch-style Linear init: U(-1/sqrt(fan_in), 1/sqrt(fan_in))
    fan_in = 28 * 28
    bound = 1.0 / (fan_in ** 0.5)
    w = jax.random.uniform(k_w, (fan_in, 10), jnp.float32, -bound, bound)
    b = jax.random.uniform(k_b, (10,), jnp.float32, -bound, bound)

    y = one_layer_network(x, w, b)
    jax.block_until_ready(y)

    # Sanity check against plain-JAX reference.
    y_ref = jnp.maximum(x.reshape(B, -1) @ w + b, 0.0)
    assert y.shape == (B, 10)
    assert jnp.allclose(y, y_ref, atol=1e-5, rtol=1e-5)

    print("KERNEL_OK")
</pallas_src>

<mosaic_0001>
module attributes {stable_mosaic.version = 11 : i64} {
  func.func @linear_relu_kernel(%arg0: i32, %arg1: memref<2x784xf32, #tpu.memory_space<vmem>>, %arg2: memref<784x10xf32, #tpu.memory_space<vmem>>, %arg3: memref<1x10xf32, #tpu.memory_space<vmem>>, %arg4: memref<2x10xf32, #tpu.memory_space<vmem>>) attributes {dimension_semantics = [#tpu.dimension_semantics<parallel>], iteration_bounds = array<i64: 1>, scalar_prefetch = 0 : i64, scratch_operands = 0 : i64, tpu.core_type = #tpu.core_type<tc>, window_params = [{transform_indices = @transform_0, window_bounds = array<i64: 2, 784>}, {pipeline_mode = #tpu.pipeline_mode<synchronous>, transform_indices = @transform_1, window_bounds = array<i64: 784, 10>}, {pipeline_mode = #tpu.pipeline_mode<synchronous>, transform_indices = @transform_2, window_bounds = array<i64: 1, 10>}, {transform_indices = @transform_3, window_bounds = array<i64: 2, 10>}]} {
    %c0 = arith.constant 0 : index
    %c0_0 = arith.constant 0 : index
    %0 = vector.load %arg1[%c0, %c0_0] : memref<2x784xf32, #tpu.memory_space<vmem>>, vector<2x784xf32>
    %c0_1 = arith.constant 0 : index
    %c0_2 = arith.constant 0 : index
    %1 = vector.load %arg2[%c0_1, %c0_2] : memref<784x10xf32, #tpu.memory_space<vmem>>, vector<784x10xf32>
    %cst = arith.constant dense<0.000000e+00> : vector<2x10xf32>
    %2 = tpu.matmul %0, %1, %cst {dimension_numbers = #tpu.dot_dimension_numbers<[1], [0], [0], [1], [0, 0, 1, 1], [], []>} : vector<2x784xf32>, vector<784x10xf32>, vector<2x10xf32> -> vector<2x10xf32>
    %c0_3 = arith.constant 0 : index
    %c0_4 = arith.constant 0 : index
    %3 = vector.load %arg3[%c0_3, %c0_4] : memref<1x10xf32, #tpu.memory_space<vmem>>, vector<1x10xf32>
    %4 = vector.broadcast %3 : vector<1x10xf32> to vector<2x10xf32>
    %5 = arith.addf %2, %4 : vector<2x10xf32>
    %cst_5 = arith.constant 0.000000e+00 : f32
    %6 = vector.broadcast %cst_5 : f32 to vector<2x10xf32>
    %7 = arith.maximumf %5, %6 : vector<2x10xf32>
    %c0_6 = arith.constant 0 : index
    %c0_7 = arith.constant 0 : index
    %8 = vector.load %arg4[%c0_6, %c0_7] : memref<2x10xf32, #tpu.memory_space<vmem>>, vector<2x10xf32>
    tpu.vector_store %arg4[%c0_6, %c0_7], %7 {strides = array<i32>} : memref<2x10xf32, #tpu.memory_space<vmem>>, vector<2x10xf32>,
    return
  }
  func.func @transform_0(%arg0: i32) -> (i32, i32) {
    %c0_i32 = arith.constant 0 : i32
    %c0_i32_0 = arith.constant 0 : i32
    return %arg0, %c0_i32 : i32, i32
  }
  func.func @transform_1(%arg0: i32) -> (i32, i32) {
    %c0_i32 = arith.constant 0 : i32
    %c0_i32_0 = arith.constant 0 : i32
    %c0_i32_1 = arith.constant 0 : i32
    return %c0_i32, %c0_i32_0 : i32, i32
  }
  func.func @transform_2(%arg0: i32) -> (i32, i32) {
    %c0_i32 = arith.constant 0 : i32
    %c0_i32_0 = arith.constant 0 : i32
    %c0_i32_1 = arith.constant 0 : i32
    return %c0_i32, %c0_i32_0 : i32, i32
  }
  func.func @transform_3(%arg0: i32) -> (i32, i32) {
    %c0_i32 = arith.constant 0 : i32
    %c0_i32_0 = arith.constant 0 : i32
    return %arg0, %c0_i32 : i32, i32
  }
}

</mosaic_0001>

<bundles_post_ra>
// kernel: tpu_custom_call.1
= control target key start
LH: loop header
LB: loop body
LE: loop exit
PB: predicated region body
PF: predicated region fallthrough
CT: control target
= control target key end

     0   :  { %v710_v43 = vmov 1983009808   ;;  %v128_v45 = vlaneseq  ;;  %s1061_s0 = inlined_call_operand.vmem [shape: f32[2,784], index: 0, kind: input, shape index: {}]   ;;  %s1062_s1 = inlined_call_operand.vmem [shape: f32[784,10], index: 1, kind: input, shape index: {}]   ;;  %s1063_s2 = inlined_call_operand.vmem [shape: f32[1,10], index: 2, kind: input, shape index: {}]   ;;  %s1064_s3 = inlined_call_operand.hbm [shape: f32[2,10], index: 3, kind: output, shape index: {}]  }
   0x1   :  { %v33_v0 = vld [vmem:[%s1062_s1 + $0x80] sm:$0xff]  ;;  %v34_v1 = vld [vmem:[%s1062_s1 + $0x88] sm:$0xff]  ;;  %v35_v11 = vld [vmem:[%s1062_s1 + $0x90] sm:$0xff]  ;;  %v126_v44 = vunpack.c.l.s4 %v710_v43 }
   0x2   :  { %v17_v2 = vld [vmem:[%s1062_s1] sm:$0xff]  ;;  %v580_v3 = vpack.c.bf16 %v34_v1, %v33_v0  ;;  %v18_v4 = vld [vmem:[%s1062_s1 + $0x8] sm:$0xff]  ;;  %v36_v13 = vld [vmem:[%s1062_s1 + $0x98] sm:$0xff]  ;;  %v129_v60 = vshrl.u32 %v128_v45, 7 }
   0x3   :  { %v65_v5 = vld [vmem:[%s1062_s1 + $0x180] sm:$0xff]  ;;  %v66_v6 = vld [vmem:[%s1062_s1 + $0x188] sm:$0xff]  ;;  %v582_v7 = vpack.c.bf16 %v18_v4, %v17_v2  ;;  %v19_v14 = vld [vmem:[%s1062_s1 + $0x10] sm:$0xff]  ;;  %v584_v16 = vpack.c.bf16 %v36_v13, %v35_v11  ;;  %v127_v59 = vunpack.c.0.s8 %v126_v44 }
   0x4   :  { %v612_v8 = vpack.c.bf16 %v66_v6, %v65_v5  ;;  %v49_v9 = vld [vmem:[%s1062_s1 + $0x100] sm:$0xff]  ;;  %v50_v10 = vld [vmem:[%s1062_s1 + $0x108] sm:$0xff]  ;;  %581 = vmatprep.subr.bf16.mxu0 %v580_v3  ;;  %v20_v15 = vld [vmem:[%s1062_s1 + $0x18] sm:$0xff] }
   0x5   :  { %v614_v12 = vpack.c.bf16 %v50_v10, %v49_v9  ;;  %583 = vmatpush3.bf16.msra.mxu0 %v582_v7  ;;  %v586_v17 = vpack.c.bf16 %v20_v15, %v19_v14  ;;  %v67_v18 = vld [vmem:[%s1062_s1 + $0x190] sm:$0xff]  ;;  %v68_v19 = vld [vmem:[%s1062_s1 + $0x198] sm:$0xff]  ;;  %v37_v23 = vld [vmem:[%s1062_s1 + $0xa0] sm:$0xff]  ;;  %v879_v10 = vsub.s32 %v127_v59, %v129_v60 }
   0x6   :  { %613 = vmatprep.subr.bf16.mxu1 %v612_v8  ;;  %v51_v20 = vld [vmem:[%s1062_s1 + $0x110] sm:$0xff]  ;;  %v616_v21 = vpack.c.bf16 %v68_v19, %v67_v18  ;;  %v52_v22 = vld [vmem:[%s1062_s1 + $0x118] sm:$0xff]  ;;  %v38_v24 = vld [vmem:[%s1062_s1 + $0xa8] sm:$0xff]  ;;  %585 = vmatprep.subr.bf16.mxu0 %v584_v16 }
   0x7   :  { %615 = vmatpush3.bf16.msra.mxu1 %v614_v12  ;;  %v618_v25 = vpack.c.bf16 %v52_v22, %v51_v20  ;;  %v588_v26 = vpack.c.bf16 %v38_v24, %v37_v23  ;;  %v21_v27 = vld [vmem:[%s1062_s1 + $0x20] sm:$0xff]  ;;  %v22_v28 = vld [vmem:[%s1062_s1 + $0x28] sm:$0xff]  ;;  %v39_v35 = vld [vmem:[%s1062_s1 + $0xb0] sm:$0xff] }
   0x8   :  { %v69_v29 = vld [vmem:[%s1062_s1 + $0x1a0] sm:$0xff]  ;;  %617 = vmatprep.subr.bf16.mxu1 %v616_v21  ;;  %v70_v30 = vld [vmem:[%s1062_s1 + $0x1a8] sm:$0xff]  ;;  %v590_v33 = vpack.c.bf16 %v22_v28, %v21_v27  ;;  %v40_v36 = vld [vmem:[%s1062_s1 + $0xb8] sm:$0xff] }
   0x9   :  { %v53_v31 = vld [vmem:[%s1062_s1 + $0x120] sm:$0xff]  ;;  %v54_v32 = vld [vmem:[%s1062_s1 + $0x128] sm:$0xff]  ;;  %587 = vmatpush3.bf16.msra.mxu0 %v586_v17  ;;  %v620_v34 = vpack.c.bf16 %v70_v30, %v69_v29  ;;  %v23_v37 = vld [vmem:[%s1062_s1 + $0x30] sm:$0xff]  ;;  %v592_v39 = vpack.c.bf16 %v40_v36, %v39_v35 }
   0xa   :  { %589 = vmatprep.subr.bf16.mxu0 %v588_v26  ;;  %v622_v38 = vpack.c.bf16 %v54_v32, %v53_v31  ;;  %v24_v40 = vld [vmem:[%s1062_s1 + $0x38] sm:$0xff]  ;;  %v71_v41 = vld [vmem:[%s1062_s1 + $0x1b0] sm:$0xff]  ;;  %v41_v49 = vld [vmem:[%s1062_s1 + $0xc0] sm:$0xff] }
   0xb   :  { %619 = vmatpush3.bf16.msra.mxu1 %v618_v25  ;;  %v72_v42 = vld [vmem:[%s1062_s1 + $0x1b8] sm:$0xff]  ;;  %v55_v47 = vld [vmem:[%s1062_s1 + $0x130] sm:$0xff]  ;;  %v42_v50 = vld [vmem:[%s1062_s1 + $0xc8] sm:$0xff]  ;;  %v594_v51 = vpack.c.bf16 %v24_v40, %v23_v37 }
   0xc   :  { %621 = vmatprep.subr.bf16.mxu1 %v620_v34  ;;  %v624_v46 = vpack.c.bf16 %v72_v42, %v71_v41  ;;  %v56_v48 = vld [vmem:[%s1062_s1 + $0x138] sm:$0xff]  ;;  %v73_v52 = vld [vmem:[%s1062_s1 + $0x1c0] sm:$0xff]  ;;  %v74_v53 = vld [vmem:[%s1062_s1 + $0x1c8] sm:$0xff]  ;;  %v596_v55 = vpack.c.bf16 %v42_v50, %v41_v49 }
   0xd   :  { %591 = vmatpush3.bf16.msra.mxu0 %v590_v33  ;;  %v626_v54 = vpack.c.bf16 %v56_v48, %v55_v47  ;;  %v25_v56 = vld [vmem:[%s1062_s1 + $0x40] sm:$0xff]  ;;  %v26_v57 = vld [vmem:[%s1062_s1 + $0x48] sm:$0xff]  ;;  %v628_v61 = vpack.c.bf16 %v74_v53, %v73_v52  ;;  %v43_v63 = vld [vmem:[%s1062_s1 + $0xd0] sm:$0xff] }
   0xe   :  { %593 = vmatprep.subr.bf16.mxu0 %v592_v39  ;;  %v57_v58 = vld [vmem:[%s1062_s1 + $0x140] sm:$0xff]  ;;  %v58_v62 = vld [vmem:[%s1062_s1 + $0x148] sm:$0xff]  ;;  %v44_v0 = vld [vmem:[%s1062_s1 + $0xd8] sm:$0xff]  ;;  %v598_v3 = vpack.c.bf16 %v26_v57, %v25_v56 }
   0xf   :  { %623 = vmatpush3.bf16.msra.mxu1 %v622_v38  ;;  %v75_v1 = vld [vmem:[%s1062_s1 + $0x1d0] sm:$0xff]  ;;  %v76_v2 = vld [vmem:[%s1062_s1 + $0x1d8] sm:$0xff]  ;;  %v630_v5 = vpack.c.bf16 %v58_v62, %v57_v58  ;;  %v600_v6 = vpack.c.bf16 %v44_v0, %v43_v63  ;;  %v45_v12 = vld [vmem:[%s1062_s1 + $0xe0] sm:$0xff] }
  0x10   :  { %625 = vmatprep.subr.bf16.mxu1 %v624_v46  ;;  %v27_v4 = vld [vmem:[%s1062_s1 + $0x50] sm:$0xff]  ;;  %v28_v7 = vld [vmem:[%s1062_s1 + $0x58] sm:$0xff]  ;;  %v632_v11 = vpack.c.bf16 %v76_v2, %v75_v1  ;;  %v46_v13 = vld [vmem:[%s1062_s1 + $0xe8] sm:$0xff] }
  0x11   :  { %595 = vmatpush3.bf16.msra.mxu0 %v594_v51  ;;  %v59_v8 = vld [vmem:[%s1062_s1 + $0x150] sm:$0xff]  ;;  %v60_v9 = vld [vmem:[%s1062_s1 + $0x158] sm:$0xff]  ;;  %v77_v14 = vld [vmem:[%s1062_s1 + $0x1e0] sm:$0xff]  ;;  %v602_v16 = vpack.c.bf16 %v28_v7, %v27_v4  ;;  %v604_v19 = vpack.c.bf16 %v46_v13, %v45_v12 }
  0x12   :  { %597 = vmatprep.subr.bf16.mxu0 %v596_v55  ;;  %v78_v15 = vld [vmem:[%s1062_s1 + $0x1e8] sm:$0xff]  ;;  %v634_v17 = vpack.c.bf16 %v60_v9, %v59_v8  ;;  %v15_v18 = vld [vmem:[%s1061_s0] sm:$0xff]  ;;  %v47_v27 = vld [vmem:[%s1062_s1 + $0xf0] sm:$0xff] }
  0x13   :  { %627 = vmatpush3.bf16.msra.mxu1 %v626_v54  ;;  %v29_v20 = vld [vmem:[%s1062_s1 + $0x60] sm:$0xff]  ;;  %v30_v21 = vld [vmem:[%s1062_s1 + $0x68] sm:$0xff]  ;;  %v131_v23 = vrot.slane %v15_v18, %v879_v10  ;;  %v124_v24 = vcombine.high %v15_v18, %v15_v18  ;;  %v636_v25 = vpack.c.bf16 %v78_v15, %v77_v14  ;;  %v48_v28 = vld [vmem:[%s1062_s1 + $0xf8] sm:$0xff] }
  0x14   :  { %629 = vmatprep.subr.bf16.mxu1 %v628_v61  ;;  %v61_v22 = vld [vmem:[%s1062_s1 + $0x160] sm:$0xff]  ;;  %v62_v26 = vld [vmem:[%s1062_s1 + $0x168] sm:$0xff]  ;;  %v79_v29 = vld [vmem:[%s1062_s1 + $0x1f0] sm:$0xff]  ;;  %v606_v33 = vpack.c.bf16 %v30_v21, %v29_v20  ;;  %v608_v35 = vpack.c.bf16 %v48_v28, %v47_v27 }
  0x15   :  { %599 = vmatpush3.bf16.msra.mxu0 %v598_v3  ;;  %v80_v30 = vld [vmem:[%s1062_s1 + $0x1f8] sm:$0xff]  ;;  %v139_v31 = vcombine.high %v131_v23, %v131_v23  ;;  %v138_v32 = vrot.slane %v124_v24, %v879_v10  ;;  %v638_v34 = vpack.c.bf16 %v62_v26, %v61_v22  ;;  %v31_v36 = vld [vmem:[%s1062_s1 + $0x70] sm:$0xff]  ;;  %v97_v42 = vld [vmem:[%s1062_s1 + $0x280] sm:$0xff] }
  0x16   :  { %601 = vmatprep.subr.bf16.mxu0 %v600_v6  ;;  %v32_v37 = vld [vmem:[%s1062_s1 + $0x78] sm:$0xff]  ;;  %v63_v38 = vld [vmem:[%s1062_s1 + $0x170] sm:$0xff]  ;;  %v640_v40 = vpack.c.bf16 %v80_v30, %v79_v29  ;;  %v98_v43 = vld [vmem:[%s1062_s1 + $0x288] sm:$0xff] }
  0x17   :  { %631 = vmatpush3.bf16.msra.mxu1 %v630_v5  ;;  %v140_v39 = vcombine.high %v138_v32, %v138_v32  ;;  %230 = vmatprep.mubr.f32.mxu0 %v139_v31  ;;  %v64_v41 = vld [vmem:[%s1062_s1 + $0x178] sm:$0xff]  ;;  %v610_v44 = vpack.c.bf16 %v32_v37, %v31_v36  ;;  %v644_v46 = vpack.c.bf16 %v98_v43, %v97_v42  ;;  %v81_v47 = vld [vmem:[%s1062_s1 + $0x200] sm:$0xff]  ;;  %v82_v48 = vld [vmem:[%s1062_s1 + $0x208] sm:$0xff] }
  0x18   :  { %633 = vmatprep.subr.bf16.mxu1 %v632_v11  ;;  %v642_v45 = vpack.c.bf16 %v64_v41, %v63_v38  ;;  %v99_v49 = vld [vmem:[%s1062_s1 + $0x290] sm:$0xff]  ;;  %v100_v50 = vld [vmem:[%s1062_s1 + $0x298] sm:$0xff]  ;;  %v646_v51 = vpack.c.bf16 %v82_v48, %v81_v47  ;;  %v16_v53 = vld [vmem:[%s1061_s0 + $0x8] sm:$0x3f] }
  0x19   :  { %603 = vmatpush3.bf16.msra.mxu0 %v602_v16  ;;  %300 = vmatprep.mubr.f32.mxu1 %v140_v39  ;;  %v83_v52 = vld [vmem:[%s1062_s1 + $0x210] sm:$0xff]  ;;  %v113_v54 = vld [vmem:[%s1062_s1 + $0x300] sm:$0xff]  ;;  %v648_v55 = vpack.c.bf16 %v100_v50, %v99_v49  ;;  %v84_v56 = vld [vmem:[%s1062_s1 + $0x218] sm:$0xff]  ;;  %v141_v57 = vcombine.high %v16_v53, %v16_v53  ;;  %v965_v58 = vrot.slane %v16_v53, %v879_v10 }
  0x1a   :  { %605 = vmatprep.subr.bf16.mxu0 %v604_v19  ;;  %v114_v59 = vld [vmem:[%s1062_s1 + $0x308] sm:$0xff] }
  0x1b   :  { %635 = vmatpush3.bf16.msra.mxu1 %v634_v17 }
  0x1c   :  { %637 = vmatprep.subr.bf16.mxu1 %v636_v25 }
  0x1d   :  { %607 = vmatpush3.bf16.msra.mxu0 %v606_v33 }
  0x1e   :  { %609 = vmatprep.subr.bf16.mxu0 %v608_v35 }
  0x1f   :  { %639 = vmatpush3.bf16.msra.mxu1 %v638_v34 }
  0x20   :  { %641 = vmatprep.subr.bf16.mxu1 %v640_v40 }
  0x21   :  { %611 = vmatpush3.bf16.msra.mxu0 %v610_v44 }
  0x22   :  { %645 = vmatprep.subr.bf16.mxu0 %v644_v46 }
  0x23   :  { %643 = vmatpush3.bf16.msra.mxu1 %v642_v45 }
  0x24   :  { %8 = vsyncpa [#allocation3], 0  ;;  %v101_v60 = vld [vmem:[%s1062_s1 + $0x2a0] sm:$0xff]  ;;  %v102_v61 = vld [vmem:[%s1062_s1 + $0x2a8] sm:$0xff]  ;;  %v711_v62 = vmov 0.0|0.0   ;;  %v677_v63 = vpack.c.bf16 %v114_v59, %v113_v54  ;;  %231 = vmatmul.mubr.f32.vlgmr.msra.gmra.mrb[0].mxu0 %v131_v23  ;;  %v156_v0 = vcombine.high %v965_v58, %v965_v58  ;;  %v650_v1 = vpack.c.bf16 %v84_v56, %v83_v52 }
  0x25   :  { %676 = vmatprep.subr.bf16.mxu1 %v711_v62  ;;  %647 = vmatpush3.bf16.msra.mxu0 %v646_v51  ;;  %v652_v2 = vpack.c.bf16 %v102_v61, %v101_v60  ;;  %v85_v3 = vld [vmem:[%s1062_s1 + $0x220] sm:$0xff]  ;;  %v86_v4 = vld [vmem:[%s1062_s1 + $0x228] sm:$0xff]  ;;  %v155_v5 = vrot.slane %v141_v57, %v879_v10  ;;  %v103_v6 = vld [vmem:[%s1062_s1 + $0x2b0] sm:$0xff]  ;;  %vm712_vm0 = vmmov 0   ;;  %v713_v8 = vmov 0.0  }
  0x26   :  { %301 = vmatmul.mubr.f32.vlgmr.msra.gmra.mrb[0].mxu1 %v138_v32  ;;  %649 = vmatprep.subr.bf16.mxu0 %v648_v55  ;;  %v104_v7 = vld [vmem:[%s1062_s1 + $0x2b8] sm:$0xff]  ;;  %vm163_vm1 = vcmask 130048   ;;  %v654_v9 = vpack.c.bf16 %v86_v4, %v85_v3  ;;  %v87_v10 = vld [vmem:[%s1062_s1 + $0x230] sm:$0xff]  ;;  %v105_v13 = vld [vmem:[%s1062_s1 + $0x2c0] sm:$0xff]  ;;  %vm447_vm2 = vcmask 74752  }
  0x27   :  { %370 = vmatprep.mubr.f32.mxu0 %v156_v0  ;;  %678 = vmatpush3.bf16.msra.mxu1 %v677_v63  ;;  %v656_v11 = vpack.c.bf16 %v104_v7, %v103_v6  ;;  %v88_v12 = vld [vmem:[%s1062_s1 + $0x238] sm:$0xff]  ;;  %v106_v14 = vld [vmem:[%s1062_s1 + $0x2c8] sm:$0xff]  ;;  %v89_v17 = vld [vmem:[%s1062_s1 + $0x240] sm:$0xff] }
  0x28   :  { %577 = vmatprep.mubr.msk.f32.mxu1 %vm712_vm0, %v713_v8  ;;  %v658_v15 = vpack.c.bf16 %v88_v12, %v87_v10  ;;  %v660_v16 = vpack.c.bf16 %v106_v14, %v105_v13  ;;  %v90_v18 = vld [vmem:[%s1062_s1 + $0x248] sm:$0xff]  ;;  %v107_v19 = vld [vmem:[%s1062_s1 + $0x2d0] sm:$0xff]  ;;  %v108_v20 = vld [vmem:[%s1062_s1 + $0x2d8] sm:$0xff] }
  0x29   :  { %651 = vmatpush3.bf16.msra.mxu0 %v650_v1  ;;  %v662_v21 = vpack.c.bf16 %v90_v18, %v89_v17  ;;  %v664_v22 = vpack.c.bf16 %v108_v20, %v107_v19  ;;  %v91_v23 = vld [vmem:[%s1062_s1 + $0x250] sm:$0xff]  ;;  %v92_v24 = vld [vmem:[%s1062_s1 + $0x258] sm:$0xff]  ;;  %v109_v25 = vld [vmem:[%s1062_s1 + $0x2e0] sm:$0xff] }
  0x2a   :  { %653 = vmatprep.subr.bf16.mxu0 %v652_v2  ;;  %578 = vmatmul.mubr.msk.f32.vlgmr.msra.gmra.mrb[2].mxu1 %vm163_vm1, %v155_v5  ;;  %v110_v26 = vld [vmem:[%s1062_s1 + $0x2e8] sm:$0xff]  ;;  %v666_v27 = vpack.c.bf16 %v92_v24, %v91_v23  ;;  %v93_v29 = vld [vmem:[%s1062_s1 + $0x260] sm:$0xff]  ;;  %v111_v31 = vld [vmem:[%s1062_s1 + $0x2f0] sm:$0xff] }
  0x2b   :  { %v668_v28 = vpack.c.bf16 %v110_v26, %v109_v25  ;;  %v94_v30 = vld [vmem:[%s1062_s1 + $0x268] sm:$0xff]  ;;  %v112_v32 = vld [vmem:[%s1062_s1 + $0x2f8] sm:$0xff]  ;;  %v95_v35 = vld [vmem:[%s1062_s1 + $0x270] sm:$0xff] }
  0x2c   :  { %v670_v33 = vpack.c.bf16 %v94_v30, %v93_v29  ;;  %v672_v34 = vpack.c.bf16 %v112_v32, %v111_v31  ;;  %v96_v36 = vld [vmem:[%s1062_s1 + $0x278] sm:$0xff]  ;;  %v463_v39 = vld [vmem:[%s1063_s2] ss:$0 sm:$0xff]  ;;  %s714_s1 = smov [#allocation2]  }
  0x2d   :  { %655 = vmatpush3.bf16.msra.mxu0 %v654_v9  ;;  %v674_v37 = vpack.c.bf16 %v96_v36, %v95_v35  ;;  %s455_s23 = sshll.u32 %s714_s1, 4  ;;  %s456_s23 = int_to_ptr.vmem [resolvable:$true] %s455_s23 }
  0x2e   :  { %657 = vmatprep.subr.bf16.mxu0 %v656_v11  ;;  %s686_s2 = scalar_lea.vmem %s456_s23, 32  ;;  %p691_p1 = scmp.lt.s32.totalorder %s456_s23, %s456_s23 }
  0x2f   :  { %p687_p0 = scmp.ne.s32.totalorder %s456_s23, %s686_s2  ;;  %p692_p2 = scmp.lt.s32.totalorder %s686_s2, %s686_s2 }
  0x31   :  { %659 = vmatpush3.bf16.msra.mxu0 %v658_v15  ;;  %p693_p3 = por %p692_p2, %p691_p1 }
  0x32   :  { %661 = vmatprep.subr.bf16.mxu0 %v660_v16 }
  0x33   :  { %p694_p4 = pnand %p693_p3, %p687_p0 }
  0x35   :  { %663 = vmatpush3.bf16.msra.mxu0 %v662_v21 }
  0x36   :  { %665 = vmatprep.subr.bf16.mxu0 %v664_v22 }
  0x39   :  { %667 = vmatpush3.bf16.msra.mxu0 %v666_v27 }
  0x3a   :  { %669 = vmatprep.subr.bf16.mxu0 %v668_v28 }
  0x3d   :  { %671 = vmatpush3.bf16.msra.mxu0 %v670_v33 }
  0x3e   :  { %673 = vmatprep.subr.bf16.mxu0 %v672_v34 }
  0x41   :  { %675 = vmatpush3.bf16.msra.mxu0 %v674_v37 }
  0x44   :  { %371 = vmatmul.mubr.f32.vlgmr.msra.gmra.mrb[2].mxu0 %v965_v58 }
  0xf7   :  { %v497_v38 = vpop.f32.mrb[0].mxu0 }
  0xf8   :  { %v498_v40 = vpop.f32.mrb[1].mxu0 }
  0xf9   :  { %v532_v41 = vpop.f32.mrb[0].mxu1  ;;  %v499_v42 = vadd.f32 %v498_v40, %v497_v38 }
  0xfa   :  { %v533_v43 = vpop.f32.mrb[1].mxu1 }
  0xfb   :  { %v534_v44 = vadd.f32 %v533_v43, %v532_v41  ;;  %v233_v45 = vadd.f32 %v499_v42, %v463_v39 }
  0xfd   :  { %v303_v46 = vadd.f32 %v534_v44, %v233_v45  ;;  %v442_v47 = vpop.f32.mrb[2].mxu1 }
  0xfe   :  { %v579_v48 = vpop.f32.mrb[3].mxu1 }
 0x117   :  { %v567_v49 = vpop.f32.mrb[2].mxu0 }
 0x118   :  { %v568_v50 = vpop.f32.mrb[3].mxu0 }
 0x119   :  { %v569_v51 = vadd.f32 %v568_v50, %v567_v49 }
 0x11b   :  { %v373_v52 = vadd.f32 %v569_v51, %v303_v46 }
 0x11d   :  { %v443_v53 = vadd.f32 %v442_v47, %v373_v52 }
 0x11f   :  { %v446_v54 = vmax.f32 %v443_v53, 0.0 }
 0x121   :  { %448 = vst.msk [vmem:[#allocation2] sm:$0x3] %vm447_vm2, %v446_v54 }
 0x122   :  { %697 = shalt.err (!%p694_p4)
}
 0x123   :  { %s698_s26 = scalar_lea.hbm %s1064_s3, 32 }
 0x124   :  { %p699_p5 = scmp.ne.s32.totalorder %s1064_s3, %s698_s26  ;;  %p702_p6 = scmp.lt.u32.totalorder %s698_s26, %s1064_s3 }
 0x126   :  { %p704_p7 = pnand %p702_p6, %p699_p5 }
 0x128   :  { %707 = shalt.err (!%p704_p7)
}
 0x129   :  { %458 = dma.vmem_to_hbm [thread:$0]  %s456_s23, 32, %s1064_s3, [#allocation3]  }
 0x12a   :  { %708 = dma.done.wait [#allocation3], 32  }
 0x12b   :  { %709 = vsyncadd [#allocation3], 4294967264 }
 0x12c   :  { %462 = vsyncpa [#allocation3], 1 }

</bundles_post_ra>
